<compile_context>
chip_gen: v7x
topology: tpu7x:2x2x1
jax: 0.10.0
libtpu: 0.0.40
codegen_flags: <defaults>
</compile_context>

<pallas_src>
import math
import functools

import jax
import jax.numpy as jnp
from jax.experimental import pallas as pl
from jax.experimental.pallas import tpu as pltpu


_VMEM_LIMIT_BYTES = 64 * 1024 * 1024


# ---------------------------------------------------------------------------
# helpers
# ---------------------------------------------------------------------------

def _layernorm(x, gamma, beta, eps=1e-5):
    # x: (rows, D); gamma/beta: (1, D).  PyTorch LayerNorm (biased variance).
    mean = jnp.mean(x, axis=-1, keepdims=True)
    var = jnp.mean((x - mean) ** 2, axis=-1, keepdims=True)
    return (x - mean) * jax.lax.rsqrt(var + eps) * gamma + beta


def _pick_row_tile(m, preferred):
    # Largest convenient row tile that evenly divides the folded B*L rows.
    for t in (preferred, 256, 128):
        if m >= t and m % t == 0:
            return t
    return m  # small problem: single full-height block


def _weight_spec():
    # Grid-invariant parameter: single copy resident in VMEM for the whole
    # kernel (no per-grid-step double buffering).
    return pl.BlockSpec(memory_space=pltpu.MemorySpace.VMEM)


def _compiler_params():
    return pltpu.CompilerParams(dimension_semantics=("parallel",),
                                vmem_limit_bytes=_VMEM_LIMIT_BYTES)


# ---------------------------------------------------------------------------
# kernels
# ---------------------------------------------------------------------------

def _qkv_kernel(x_ref, wq_ref, bq_ref, wk_ref, bk_ref, wv_ref, bv_ref,
                q_ref, k_ref, v_ref, *, scale):
    x = x_ref[...]                                     # (TM, D) compute dtype
    q = jnp.dot(x, wq_ref[...], preferred_element_type=jnp.float32) + bq_ref[...]
    q_ref[...] = (q * scale).astype(q_ref.dtype)       # fold 1/sqrt(DH) into q
    k = jnp.dot(x, wk_ref[...], preferred_element_type=jnp.float32) + bk_ref[...]
    k_ref[...] = k.astype(k_ref.dtype)
    v = jnp.dot(x, wv_ref[...], preferred_element_type=jnp.float32) + bv_ref[...]
    v_ref[...] = v.astype(v_ref.dtype)


def _attn_kernel(x_ref, q_ref, k_ref, v_ref, wo_ref, bo_ref, g1_ref, b1_ref,
                 y_ref, attn_ref=None, *, approx_reciprocal=True):
    # One example per grid step; all heads batched into leading-batch einsums.
    q = q_ref[0]                                       # (H, L, DH)
    k = k_ref[0]
    v = v_ref[0]
    # scores (scale already folded into q)
    s = jnp.einsum("hqd,hkd->hqk", q, k, preferred_element_type=jnp.float32)
    s = s - jnp.max(s, axis=-1, keepdims=True)
    p = jnp.exp(s)
    denom = jnp.sum(p, axis=-1, keepdims=True)
    if approx_reciprocal:
        p = p * pl.reciprocal(denom, approx=True)      # EUP slot
    else:
        p = p / denom
    if attn_ref is not None:
        attn_ref[0] = p
    ctx = jnp.einsum("hqk,hkd->hqd", p.astype(v.dtype), v,
                     preferred_element_type=jnp.float32)   # (H, L, DH) f32
    # Fused output projection: per-head (L,DH)@(DH,D) batched matmul, then a
    # head-sum.  Equivalent to concat(heads) @ wo but needs no transpose.
    new_x = jnp.einsum("hqd,hde->hqe", ctx.astype(wo_ref.dtype), wo_ref[...],
                       preferred_element_type=jnp.float32).sum(axis=0)
    new_x = new_x + bo_ref[...]
    # residual + norm1 (f32)
    y_ref[0] = _layernorm(x_ref[0] + new_x,
                          g1_ref[...], b1_ref[...]).astype(y_ref.dtype)


def _ffn_kernel(x1_ref, wc1_ref, bc1_ref, wc2_ref, bc2_ref, g2_ref, b2_ref,
                *rest):
    # rest = (out_ref,)  or  (final_g_ref, final_b_ref, out_ref) when the
    # Encoder's final LayerNorm is fused into the last layer.
    out_ref = rest[-1]
    x1 = x1_ref[...]                                   # (TM, D) f32
    # feed-forward: 1x1 convs == pointwise linears, relu activation
    y = jnp.dot(x1.astype(wc1_ref.dtype), wc1_ref[...],
                preferred_element_type=jnp.float32) + bc1_ref[...]
    y = jnp.maximum(y, 0.0)
    y = jnp.dot(y.astype(wc2_ref.dtype), wc2_ref[...],
                preferred_element_type=jnp.float32) + bc2_ref[...]
    # residual + norm2 (f32)
    out = _layernorm(x1 + y, g2_ref[...], b2_ref[...])
    if len(rest) == 3:                                 # fused final LayerNorm
        out = _layernorm(out, rest[0][...], rest[1][...])
    out_ref[...] = out.astype(out_ref.dtype)


def _ln_kernel(x_ref, g_ref, b_ref, out_ref):
    out_ref[...] = _layernorm(x_ref[...], g_ref[...], b_ref[...]).astype(out_ref.dtype)


# ---------------------------------------------------------------------------
# wrappers
# ---------------------------------------------------------------------------

def encoder_layer_forward(x, params, n_heads, *, output_attention=True,
                          matmul_dtype=jnp.bfloat16, row_tile=256,
                          final_norm=None):
    """One NPformer EncoderLayer (self-attention + FFN) forward pass.

    If `final_norm` is given, the Encoder's trailing LayerNorm is fused into
    this layer's FFN kernel (used for the last layer of the stack).
    """
    B, L, D = x.shape
    H = n_heads
    DH = D // H
    M = B * L
    TM = _pick_row_tile(M, row_tile)
    n_row_tiles = M // TM
    cd = matmul_dtype
    scale = 1.0 / math.sqrt(DH)
    use_approx = jnp.dtype(cd) != jnp.dtype(jnp.float32)

    def row_spec():
        return pl.BlockSpec((TM, D), lambda i: (i, 0))

    x_f32 = x.astype(jnp.float32)                    # f32 residual stream
    x_c = x_f32.reshape(M, D).astype(cd)             # compute-dtype MXU copy

    wq = params["wq"].astype(cd); wk = params["wk"].astype(cd)
    wv = params["wv"].astype(cd)
    wo3 = params["wo"].reshape(H, DH, D).astype(cd)  # head-sliced out-proj
    wc1 = params["wc1"].astype(cd); wc2 = params["wc2"].astype(cd)
    bq, bk, bv, bo = params["bq"], params["bk"], params["bv"], params["bo"]
    bc1, bc2 = params["bc1"], params["bc2"]
    g1, b1 = params["ln1_g"], params["ln1_b"]
    g2, b2 = params["ln2_g"], params["ln2_b"]

    # --- 1) Q/K/V projections over all B*L rows (batch folded into M) -------
    q2d, k2d, v2d = pl.pallas_call(
        functools.partial(_qkv_kernel, scale=scale),
        out_shape=tuple(jax.ShapeDtypeStruct((M, D), cd) for _ in range(3)),
        grid_spec=pl.GridSpec(
            grid=(n_row_tiles,),
            in_specs=[row_spec()] + [_weight_spec()] * 6,
            out_specs=tuple(row_spec() for _ in range(3)),
        ),
        compiler_params=_compiler_params(),
    )(x_c, wq, bq, wk, bk, wv, bv)

    # --- 2) self-attention + out-proj + residual + LN1, per example ---------
    # wrapper-side layout plumbing only (keeps kernel stores lane-dense)
    q3 = q2d.reshape(B, L, H, DH).transpose(0, 2, 1, 3)   # (B, H, L, DH)
    k3 = k2d.reshape(B, L, H, DH).transpose(0, 2, 1, 3)
    v3 = v2d.reshape(B, L, H, DH).transpose(0, 2, 1, 3)

    head_spec = pl.BlockSpec((1, H, L, DH), lambda b: (b, 0, 0, 0))
    attn_spec = pl.BlockSpec((1, H, L, L), lambda b: (b, 0, 0, 0))
    xrow_spec = pl.BlockSpec((1, L, D), lambda b: (b, 0, 0))

    if output_attention:
        out_shape = (jax.ShapeDtypeStruct((B, L, D), jnp.float32),
                     jax.ShapeDtypeStruct((B, H, L, L), jnp.float32))
        out_specs = (xrow_spec, attn_spec)
    else:
        out_shape = jax.ShapeDtypeStruct((B, L, D), jnp.float32)
        out_specs = xrow_spec

    attn_result = pl.pallas_call(
        functools.partial(_attn_kernel, approx_reciprocal=use_approx),
        out_shape=out_shape,
        grid_spec=pl.GridSpec(
            grid=(B,),
            in_specs=[xrow_spec, head_spec, head_spec, head_spec]
                     + [_weight_spec()] * 4,
            out_specs=out_specs,
        ),
        compiler_params=_compiler_params(),
    )(x_f32, q3, k3, v3, wo3, bo, g1, b1)

    if output_attention:
        y1, attn = attn_result
    else:
        y1, attn = attn_result, None

    y1_2d = y1.reshape(M, D)

    # --- 3) FFN (1x1 convs) + residual/LN2 [+ fused final Encoder LN] -------
    ffn_inputs = [y1_2d, wc1, bc1, wc2, bc2, g2, b2]
    ffn_specs = [row_spec()] + [_weight_spec()] * 6
    if final_norm is not None:
        ffn_inputs += [final_norm["g"], final_norm["b"]]
        ffn_specs += [_weight_spec()] * 2

    out2d = pl.pallas_call(
        _ffn_kernel,
        out_shape=jax.ShapeDtypeStruct((M, D), jnp.float32),
        grid_spec=pl.GridSpec(
            grid=(n_row_tiles,),
            in_specs=ffn_specs,
            out_specs=row_spec(),
        ),
        compiler_params=_compiler_params(),
    )(*ffn_inputs)

    return out2d.reshape(B, L, D), attn


def encoder_forward(x, layer_params, norm_params, n_heads, *,
                    output_attention=True, matmul_dtype=jnp.bfloat16,
                    row_tile=256):
    """NPformer Encoder with conv_layers=None: stacked EncoderLayers + norm.

    TODO(synk): the distilling ConvLayer path (conv_layers) and the per-layer
    self.conv call of the NPformer Encoder are model-specific modules and are
    treated as identity here.
    """
    attns = []
    n_layers = len(layer_params)
    for idx, lp in enumerate(layer_params):
        fuse_norm = norm_params if (norm_params is not None and
                                    idx == n_layers - 1) else None
        x, a = encoder_layer_forward(x, lp, n_heads,
                                     output_attention=output_attention,
                                     matmul_dtype=matmul_dtype,
                                     row_tile=row_tile,
                                     final_norm=fuse_norm)
        attns.append(a)

    if norm_params is not None and n_layers == 0:
        # degenerate case: no layers, still apply the norm
        B, L, D = x.shape
        M = B * L
        TM = _pick_row_tile(M, row_tile)
        x2d = x.reshape(M, D).astype(jnp.float32)
        out2d = pl.pallas_call(
            _ln_kernel,
            out_shape=jax.ShapeDtypeStruct((M, D), jnp.float32),
            grid_spec=pl.GridSpec(
                grid=(M // TM,),
                in_specs=[pl.BlockSpec((TM, D), lambda i: (i, 0)),
                          _weight_spec(), _weight_spec()],
                out_specs=pl.BlockSpec((TM, D), lambda i: (i, 0)),
            ),
            compiler_params=_compiler_params(),
        )(x2d, norm_params["g"], norm_params["b"])
        x = out2d.reshape(B, L, D)

    return x, attns


# ---------------------------------------------------------------------------
# pure-JAX reference (matches the PyTorch module in eval mode)
# ---------------------------------------------------------------------------

def _reference_layer(x, params, n_heads):
    B, L, D = x.shape
    H = n_heads
    DH = D // H

    def ln(v, g, b, eps=1e-5):
        m = jnp.mean(v, axis=-1, keepdims=True)
        var = jnp.mean((v - m) ** 2, axis=-1, keepdims=True)
        return (v - m) / jnp.sqrt(var + eps) * g + b

    q = x @ params["wq"] + params["bq"]
    k = x @ params["wk"] + params["bk"]
    v = x @ params["wv"] + params["bv"]
    q = q.reshape(B, L, H, DH).transpose(0, 2, 1, 3)
    k = k.reshape(B, L, H, DH).transpose(0, 2, 1, 3)
    v = v.reshape(B, L, H, DH).transpose(0, 2, 1, 3)
    scores = jnp.einsum("bhld,bhmd->bhlm", q, k) / math.sqrt(DH)
    attn = jax.nn.softmax(scores, axis=-1)
    o = jnp.einsum("bhlm,bhmd->bhld", attn, v).transpose(0, 2, 1, 3).reshape(B, L, D)
    new_x = o @ params["wo"] + params["bo"]

    x1 = ln(x + new_x, params["ln1_g"], params["ln1_b"])
    y = jax.nn.relu(x1 @ params["wc1"] + params["bc1"])
    y = y @ params["wc2"] + params["bc2"]
    return ln(x1 + y, params["ln2_g"], params["ln2_b"]), attn


def reference_encoder(x, layer_params, norm_params, n_heads):
    attns = []
    for lp in layer_params:
        x, a = _reference_layer(x, lp, n_heads)
        attns.append(a)
    if norm_params is not None:
        m = jnp.mean(x, axis=-1, keepdims=True)
        var = jnp.mean((x - m) ** 2, axis=-1, keepdims=True)
        x = (x - m) / jnp.sqrt(var + 1e-5) * norm_params["g"] + norm_params["b"]
    return x, attns


# ---------------------------------------------------------------------------
# parameter init (PyTorch default Linear/Conv1d init)
# ---------------------------------------------------------------------------

def init_layer_params(key, d_model, d_ff):
    ks = jax.random.split(key, 12)

    def u(k, shape, fan_in):
        bound = 1.0 / math.sqrt(fan_in)
        return jax.random.uniform(k, shape, jnp.float32, -bound, bound)

    return {
        # attention projections (AttentionLayer: Linear(d_model, d_model) x4)
        "wq": u(ks[0], (d_model, d_model), d_model),
        "bq": u(ks[1], (1, d_model), d_model),
        "wk": u(ks[2], (d_model, d_model), d_model),
        "bk": u(ks[3], (1, d_model), d_model),
        "wv": u(ks[4], (d_model, d_model), d_model),
        "bv": u(ks[5], (1, d_model), d_model),
        "wo": u(ks[6], (d_model, d_model), d_model),
        "bo": u(ks[7], (1, d_model), d_model),
        # layer norms
        "ln1_g": jnp.ones((1, d_model), jnp.float32),
        "ln1_b": jnp.zeros((1, d_model), jnp.float32),
        "ln2_g": jnp.ones((1, d_model), jnp.float32),
        "ln2_b": jnp.zeros((1, d_model), jnp.float32),
        # conv1: Conv1d(d_model -> d_ff, k=1) folded to (d_model, d_ff)
        "wc1": u(ks[8], (d_model, d_ff), d_model),
        "bc1": u(ks[9], (1, d_ff), d_model),
        # conv2: Conv1d(d_ff -> d_model, k=1) folded to (d_ff, d_model)
        "wc2": u(ks[10], (d_ff, d_model), d_ff),
        "bc2": u(ks[11], (1, d_model), d_ff),
    }


if __name__ == "__main__":
    # small deterministic example: 2-layer encoder, B=2, L=8, d_model=32,
    # d_ff=64, 4 heads, final LayerNorm.
    B, L, D, DFF, H, N_LAYERS = 2, 8, 32, 64, 4, 2
    key = jax.random.PRNGKey(0)
    keys = jax.random.split(key, N_LAYERS + 1)
    x = jax.random.normal(keys[0], (B, L, D), jnp.float32)
    layer_params = [init_layer_params(k, D, DFF) for k in keys[1:]]
    norm_params = {"g": jnp.ones((1, D), jnp.float32),
                   "b": jnp.zeros((1, D), jnp.float32)}

    ref_out, ref_attns = reference_encoder(x, layer_params, norm_params, H)

    # 1) f32 path: verifies kernel structure exactly against the reference.
    out32, attns32 = encoder_forward(x, layer_params, norm_params, H,
                                     output_attention=True,
                                     matmul_dtype=jnp.float32)
    out32 = jax.block_until_ready(out32)
    assert jnp.allclose(out32, ref_out, atol=2e-3, rtol=2e-3)
    for a, ra in zip(attns32, ref_attns):
        assert jnp.allclose(a, ra, atol=2e-3, rtol=2e-3)

    # 2) bf16 fast path (MXU-friendly); looser tolerance vs the f32 reference.
    out_bf, attns_bf = encoder_forward(x, layer_params, norm_params, H,
                                       output_attention=True,
                                       matmul_dtype=jnp.bfloat16)
    out_bf = jax.block_until_ready(out_bf)
    assert jnp.allclose(out_bf, ref_out, atol=1e-1, rtol=1e-1)
    for a, ra in zip(attns_bf, ref_attns):
        assert jnp.allclose(a, ra, atol=5e-2, rtol=5e-2)

    # 3) output_attention=False path (no attention-weights allocation/writes).
    out_na, attns_na = encoder_forward(x, layer_params, norm_params, H,
                                       output_attention=False,
                                       matmul_dtype=jnp.bfloat16)
    out_na = jax.block_until_ready(out_na)
    assert all(a is None for a in attns_na)
    assert jnp.allclose(out_na, ref_out, atol=1e-1, rtol=1e-1)

    print("KERNEL_OK")
</pallas_src>

<mosaic_0001>
module attributes {stable_mosaic.version = 11 : i64} {
  func.func @_qkv_kernel(%arg0: i32, %arg1: memref<16x32xf32, #tpu.memory_space<vmem>>, %arg2: memref<32x32xf32, #tpu.memory_space<vmem>>, %arg3: memref<1x32xf32, #tpu.memory_space<vmem>>, %arg4: memref<32x32xf32, #tpu.memory_space<vmem>>, %arg5: memref<1x32xf32, #tpu.memory_space<vmem>>, %arg6: memref<32x32xf32, #tpu.memory_space<vmem>>, %arg7: memref<1x32xf32, #tpu.memory_space<vmem>>, %arg8: memref<16x32xf32, #tpu.memory_space<vmem>>, %arg9: memref<16x32xf32, #tpu.memory_space<vmem>>, %arg10: memref<16x32xf32, #tpu.memory_space<vmem>>) attributes {dimension_semantics = [#tpu.dimension_semantics<parallel>], iteration_bounds = array<i64: 1>, scalar_prefetch = 0 : i64, scratch_operands = 0 : i64, tpu.core_type = #tpu.core_type<tc>, window_params = [{transform_indices = @transform_0, window_bounds = array<i64: 16, 32>}, {pipeline_mode = #tpu.pipeline_mode<synchronous>, transform_indices = @transform_1, window_bounds = array<i64: 32, 32>}, {pipeline_mode = #tpu.pipeline_mode<synchronous>, transform_indices = @transform_2, window_bounds = array<i64: 1, 32>}, {pipeline_mode = #tpu.pipeline_mode<synchronous>, transform_indices = @transform_3, window_bounds = array<i64: 32, 32>}, {pipeline_mode = #tpu.pipeline_mode<synchronous>, transform_indices = @transform_4, window_bounds = array<i64: 1, 32>}, {pipeline_mode = #tpu.pipeline_mode<synchronous>, transform_indices = @transform_5, window_bounds = array<i64: 32, 32>}, {pipeline_mode = #tpu.pipeline_mode<synchronous>, transform_indices = @transform_6, window_bounds = array<i64: 1, 32>}, {transform_indices = @transform_7, window_bounds = array<i64: 16, 32>}, {transform_indices = @transform_8, window_bounds = array<i64: 16, 32>}, {transform_indices = @transform_9, window_bounds = array<i64: 16, 32>}]} {
    %c0 = arith.constant 0 : index
    %c0_0 = arith.constant 0 : index
    %0 = vector.load %arg1[%c0, %c0_0] : memref<16x32xf32, #tpu.memory_space<vmem>>, vector<16x32xf32>
    %c0_1 = arith.constant 0 : index
    %c0_2 = arith.constant 0 : index
    %1 = vector.load %arg2[%c0_1, %c0_2] : memref<32x32xf32, #tpu.memory_space<vmem>>, vector<32x32xf32>
    %cst = arith.constant dense<0.000000e+00> : vector<16x32xf32>
    %2 = tpu.matmul %0, %1, %cst {dimension_numbers = #tpu.dot_dimension_numbers<[1], [0], [0], [1], [0, 0, 1, 1], [], []>} : vector<16x32xf32>, vector<32x32xf32>, vector<16x32xf32> -> vector<16x32xf32>
    %c0_3 = arith.constant 0 : index
    %c0_4 = arith.constant 0 : index
    %3 = vector.load %arg3[%c0_3, %c0_4] : memref<1x32xf32, #tpu.memory_space<vmem>>, vector<1x32xf32>
    %4 = vector.broadcast %3 : vector<1x32xf32> to vector<16x32xf32>
    %5 = arith.addf %2, %4 : vector<16x32xf32>
    %cst_5 = arith.constant 0.353553385 : f32
    %6 = vector.broadcast %cst_5 : f32 to vector<16x32xf32>
    %7 = arith.mulf %5, %6 : vector<16x32xf32>
    %c0_6 = arith.constant 0 : index
    %c0_7 = arith.constant 0 : index
    %8 = vector.load %arg8[%c0_6, %c0_7] : memref<16x32xf32, #tpu.memory_space<vmem>>, vector<16x32xf32>
    tpu.vector_store %arg8[%c0_6, %c0_7], %7 {strides = array<i32>} : memref<16x32xf32, #tpu.memory_space<vmem>>, vector<16x32xf32>,
    %c0_8 = arith.constant 0 : index
    %c0_9 = arith.constant 0 : index
    %9 = vector.load %arg4[%c0_8, %c0_9] : memref<32x32xf32, #tpu.memory_space<vmem>>, vector<32x32xf32>
    %cst_10 = arith.constant dense<0.000000e+00> : vector<16x32xf32>
    %10 = tpu.matmul %0, %9, %cst_10 {dimension_numbers = #tpu.dot_dimension_numbers<[1], [0], [0], [1], [0, 0, 1, 1], [], []>} : vector<16x32xf32>, vector<32x32xf32>, vector<16x32xf32> -> vector<16x32xf32>
    %c0_11 = arith.constant 0 : index
    %c0_12 = arith.constant 0 : index
    %11 = vector.load %arg5[%c0_11, %c0_12] : memref<1x32xf32, #tpu.memory_space<vmem>>, vector<1x32xf32>
    %12 = vector.broadcast %11 : vector<1x32xf32> to vector<16x32xf32>
    %13 = arith.addf %10, %12 : vector<16x32xf32>
    %c0_13 = arith.constant 0 : index
    %c0_14 = arith.constant 0 : index
    %14 = vector.load %arg9[%c0_13, %c0_14] : memref<16x32xf32, #tpu.memory_space<vmem>>, vector<16x32xf32>
    tpu.vector_store %arg9[%c0_13, %c0_14], %13 {strides = array<i32>} : memref<16x32xf32, #tpu.memory_space<vmem>>, vector<16x32xf32>,
    %c0_15 = arith.constant 0 : index
    %c0_16 = arith.constant 0 : index
    %15 = vector.load %arg6[%c0_15, %c0_16] : memref<32x32xf32, #tpu.memory_space<vmem>>, vector<32x32xf32>
    %cst_17 = arith.constant dense<0.000000e+00> : vector<16x32xf32>
    %16 = tpu.matmul %0, %15, %cst_17 {dimension_numbers = #tpu.dot_dimension_numbers<[1], [0], [0], [1], [0, 0, 1, 1], [], []>} : vector<16x32xf32>, vector<32x32xf32>, vector<16x32xf32> -> vector<16x32xf32>
    %c0_18 = arith.constant 0 : index
    %c0_19 = arith.constant 0 : index
    %17 = vector.load %arg7[%c0_18, %c0_19] : memref<1x32xf32, #tpu.memory_space<vmem>>, vector<1x32xf32>
    %18 = vector.broadcast %17 : vector<1x32xf32> to vector<16x32xf32>
    %19 = arith.addf %16, %18 : vector<16x32xf32>
    %c0_20 = arith.constant 0 : index
    %c0_21 = arith.constant 0 : index
    %20 = vector.load %arg10[%c0_20, %c0_21] : memref<16x32xf32, #tpu.memory_space<vmem>>, vector<16x32xf32>
    tpu.vector_store %arg10[%c0_20, %c0_21], %19 {strides = array<i32>} : memref<16x32xf32, #tpu.memory_space<vmem>>, vector<16x32xf32>,
    return
  }
  func.func @transform_0(%arg0: i32) -> (i32, i32) {
    %c0_i32 = arith.constant 0 : i32
    %c0_i32_0 = arith.constant 0 : i32
    return %arg0, %c0_i32 : i32, i32
  }
  func.func @transform_1(%arg0: i32) -> (i32, i32) {
    %c0_i32 = arith.constant 0 : i32
    %c0_i32_0 = arith.constant 0 : i32
    %c0_i32_1 = arith.constant 0 : i32
    return %c0_i32, %c0_i32_0 : i32, i32
  }
  func.func @transform_2(%arg0: i32) -> (i32, i32) {
    %c0_i32 = arith.constant 0 : i32
    %c0_i32_0 = arith.constant 0 : i32
    %c0_i32_1 = arith.constant 0 : i32
    return %c0_i32, %c0_i32_0 : i32, i32
  }
  func.func @transform_3(%arg0: i32) -> (i32, i32) {
    %c0_i32 = arith.constant 0 : i32
    %c0_i32_0 = arith.constant 0 : i32
    %c0_i32_1 = arith.constant 0 : i32
    return %c0_i32, %c0_i32_0 : i32, i32
  }
  func.func @transform_4(%arg0: i32) -> (i32, i32) {
    %c0_i32 = arith.constant 0 : i32
    %c0_i32_0 = arith.constant 0 : i32
    %c0_i32_1 = arith.constant 0 : i32
    return %c0_i32, %c0_i32_0 : i32, i32
  }
  func.func @transform_5(%arg0: i32) -> (i32, i32) {
    %c0_i32 = arith.constant 0 : i32
    %c0_i32_0 = arith.constant 0 : i32
    %c0_i32_1 = arith.constant 0 : i32
    return %c0_i32, %c0_i32_0 : i32, i32
  }
  func.func @transform_6(%arg0: i32) -> (i32, i32) {
    %c0_i32 = arith.constant 0 : i32
    %c0_i32_0 = arith.constant 0 : i32
    %c0_i32_1 = arith.constant 0 : i32
    return %c0_i32, %c0_i32_0 : i32, i32
  }
  func.func @transform_7(%arg0: i32) -> (i32, i32) {
    %c0_i32 = arith.constant 0 : i32
    %c0_i32_0 = arith.constant 0 : i32
    return %arg0, %c0_i32 : i32, i32
  }
  func.func @transform_8(%arg0: i32) -> (i32, i32) {
    %c0_i32 = arith.constant 0 : i32
    %c0_i32_0 = arith.constant 0 : i32
    return %arg0, %c0_i32 : i32, i32
  }
  func.func @transform_9(%arg0: i32) -> (i32, i32) {
    %c0_i32 = arith.constant 0 : i32
    %c0_i32_0 = arith.constant 0 : i32
    return %arg0, %c0_i32 : i32, i32
  }
}

</mosaic_0001>

<bundles_post_ra>
// kernel: tpu_custom_call.1
= control target key start
LH: loop header
LB: loop body
LE: loop exit
PB: predicated region body
PF: predicated region fallthrough
CT: control target
= control target key end

     0   :  { %15 = vsyncpa [#allocation3], 0  ;;  %s1013_s0 = inlined_call_operand.hbm [shape: f32[16,32], index: 0, kind: input, shape index: {}]   ;;  %s1014_s1 = inlined_call_operand.hbm [shape: f32[32,32], index: 1, kind: input, shape index: {}]   ;;  %s1015_s2 = inlined_call_operand.hbm [shape: f32[1,32], index: 2, kind: input, shape index: {}]   ;;  %s1016_s3 = inlined_call_operand.hbm [shape: f32[32,32], index: 3, kind: input, shape index: {}]   ;;  %s1017_s4 = inlined_call_operand.hbm [shape: f32[1,32], index: 4, kind: input, shape index: {}]   ;;  %s1018_s5 = inlined_call_operand.hbm [shape: f32[32,32], index: 5, kind: input, shape index: {}]   ;;  %s1019_s6 = inlined_call_operand.hbm [shape: f32[1,32], index: 6, kind: input, shape index: {}]   ;;  %s1020_s7 = inlined_call_operand.hbm [shape: f32[16,32], index: 7, kind: output, shape index: {0}]   ;;  %s1021_s8 = inlined_call_operand.hbm [shape: f32[16,32], index: 8, kind: output, shape index: {1}]   ;;  %s1022_s9 = inlined_call_operand.hbm [shape: f32[16,32], index: 9, kind: output, shape index: {2}]  }
   0x1   :  { %16 = vsyncpa [#allocation6], 0 }
   0x2   :  { %17 = vsyncpa [#allocation9], 0 }
   0x3   :  { %18 = vsyncpa [#allocation12], 0 }
   0x4   :  { %19 = vsyncpa [#allocation4], 0 }
   0x5   :  { %20 = vsyncpa [#allocation16], 0  ;;  %s774_s30 = smov [#allocation5]   ;;  %s775_s11 = smov [#allocation8]  }
   0x6   :  { %s38_s10 = sshll.u32 %s774_s30, 4  ;;  %s60_s12 = sshll.u32 %s775_s11, 4  ;;  %s39_s10 = int_to_ptr.vmem [resolvable:$true] %s38_s10  ;;  %s836_s12 = int_to_ptr.vmem [resolvable:$true] %s60_s12 }
   0x7   :  { %s542_s15 = scalar_lea.hbm %s1014_s1, 512 }
   0x8   :  { %p543_p0 = scmp.ne.s32.totalorder %s1014_s1, %s542_s15  ;;  %p546_p1 = scmp.lt.u32.totalorder %s542_s15, %s1014_s1 }
   0xa   :  { %p548_p2 = pnand %p546_p1, %p543_p0 }
   0xc   :  { %551 = shalt.err (!%p548_p2)
}
   0xd   :  { %s552_s20 = scalar_lea.vmem %s39_s10, 512  ;;  %p557_p4 = scmp.lt.s32.totalorder %s39_s10, %s39_s10 }
   0xe   :  { %p553_p3 = scmp.ne.s32.totalorder %s39_s10, %s552_s20  ;;  %p558_p5 = scmp.lt.s32.totalorder %s552_s20, %s552_s20 }
  0x10   :  { %p559_p6 = por %p558_p5, %p557_p4 }
  0x12   :  { %p560_p7 = pnand %p559_p6, %p553_p3 }
  0x14   :  { %563 = shalt.err (!%p560_p7)
}
  0x15   :  { %s776_s21 = smov 128   ;;  %s777_s22 = smov 8  }
  0x16   :  { %44 = dma.hbm_to_vmem [thread:$0]  %s1014_s1, 512, %s39_s10, [#allocation6], %s776_s21, %s776_s21, %s777_s22  }
  0x17   :  { %s564_s27 = scalar_lea.hbm %s1016_s3, 512 }
  0x18   :  { %p565_p8 = scmp.ne.s32.totalorder %s1016_s3, %s564_s27  ;;  %p568_p9 = scmp.lt.u32.totalorder %s564_s27, %s1016_s3 }
  0x1a   :  { %p570_p10 = pnand %p568_p9, %p565_p8 }
  0x1c   :  { %573 = shalt.err (!%p570_p10)
}
  0x1d   :  { %s574_s13 = scalar_lea.vmem %s836_s12, 512  ;;  %p579_p12 = scmp.lt.s32.totalorder %s836_s12, %s836_s12 }
  0x1e   :  { %p575_p11 = scmp.ne.s32.totalorder %s836_s12, %s574_s13  ;;  %p580_p13 = scmp.lt.s32.totalorder %s574_s13, %s574_s13 }
  0x20   :  { %p581_p0 = por %p580_p13, %p579_p12 }
  0x22   :  { %p582_p1 = pnand %p581_p0, %p575_p11 }
  0x24   :  { %585 = shalt.err (!%p582_p1)
}
  0x25   :  { %66 = dma.hbm_to_vmem [thread:$0]  %s1016_s3, 512, %s836_s12, [#allocation9], %s776_s21, %s776_s21, %s777_s22  }
  0x26   :  { %s778_s14 = smov [#allocation11]   ;;  %s779_s16 = smov [#allocation2]  }
  0x27   :  { %s82_s15 = sshll.u32 %s778_s14, 4  ;;  %s26_s17 = sshll.u32 %s779_s16, 4  ;;  %s83_s15 = int_to_ptr.vmem [resolvable:$true] %s82_s15  ;;  %s873_s17 = int_to_ptr.vmem [resolvable:$true] %s26_s17 }
  0x28   :  { %s586_s20 = scalar_lea.hbm %s1018_s5, 512 }
  0x29   :  { %p587_p2 = scmp.ne.s32.totalorder %s1018_s5, %s586_s20  ;;  %p590_p3 = scmp.lt.u32.totalorder %s586_s20, %s1018_s5 }
  0x2b   :  { %p592_p4 = pnand %p590_p3, %p587_p2 }
  0x2d   :  { %595 = shalt.err (!%p592_p4)
}
  0x2e   :  { %s596_s3 = scalar_lea.vmem %s83_s15, 512  ;;  %p601_p6 = scmp.lt.s32.totalorder %s83_s15, %s83_s15 }
  0x2f   :  { %p597_p5 = scmp.ne.s32.totalorder %s83_s15, %s596_s3  ;;  %p602_p7 = scmp.lt.s32.totalorder %s596_s3, %s596_s3 }
  0x31   :  { %p603_p8 = por %p602_p7, %p601_p6 }
  0x33   :  { %p604_p9 = pnand %p603_p8, %p597_p5 }
  0x35   :  { %607 = shalt.err (!%p604_p9)
}
  0x36   :  { %88 = dma.hbm_to_vmem [thread:$0]  %s1018_s5, 512, %s83_s15, [#allocation12], %s776_s21, %s776_s21, %s777_s22  }
  0x37   :  { %s608_s30 = scalar_lea.hbm %s1013_s0, 256 }
  0x38   :  { %p609_p10 = scmp.ne.s32.totalorder %s1013_s0, %s608_s30  ;;  %p612_p11 = scmp.lt.u32.totalorder %s608_s30, %s1013_s0 }
  0x3a   :  { %p614_p12 = pnand %p612_p11, %p609_p10 }
  0x3c   :  { %617 = shalt.err (!%p614_p12)
}
  0x3d   :  { %s618_s14 = scalar_lea.vmem %s873_s17, 256  ;;  %p623_p0 = scmp.lt.s32.totalorder %s873_s17, %s873_s17 }
  0x3e   :  { %p619_p13 = scmp.ne.s32.totalorder %s873_s17, %s618_s14  ;;  %p624_p1 = scmp.lt.s32.totalorder %s618_s14, %s618_s14 }
  0x40   :  { %p625_p2 = por %p624_p1, %p623_p0 }
  0x42   :  { %p626_p3 = pnand %p625_p2, %p619_p13 }
  0x44   :  { %629 = shalt.err (!%p626_p3)
}
  0x45   :  { %32 = dma.hbm_to_vmem [thread:$0]  %s1013_s0, 256, %s873_s17, [#allocation3], %s776_s21, %s776_s21, %s777_s22  }
  0x46   :  { %s780_s16 = smov [#allocation7]   ;;  %s781_s19 = smov [#allocation10]  }
  0x47   :  { %s51_s18 = sshll.u32 %s780_s16, 4  ;;  %s73_s20 = sshll.u32 %s781_s19, 4  ;;  %s52_s18 = int_to_ptr.vmem [resolvable:$true] %s51_s18  ;;  %s74_s20 = int_to_ptr.vmem [resolvable:$true] %s73_s20 }
  0x48   :  { %s630_s25 = scalar_lea.hbm %s1015_s2, 16 }
  0x49   :  { %p631_p4 = scmp.ne.s32.totalorder %s1015_s2, %s630_s25  ;;  %p634_p5 = scmp.lt.u32.totalorder %s630_s25, %s1015_s2 }
  0x4b   :  { %p636_p6 = pnand %p634_p5, %p631_p4 }
  0x4d   :  { %639 = shalt.err (!%p636_p6)
}
  0x4e   :  { %s640_s0 = scalar_lea.vmem %s52_s18, 16  ;;  %s644_s17 = scalar_lea.vmem %s52_s18, 32 }
  0x4f   :  { %p641_p7 = scmp.ne.s32.totalorder %s52_s18, %s640_s0  ;;  %p645_p8 = scmp.lt.s32.totalorder %s52_s18, %s52_s18 }
  0x50   :  { %p646_p9 = scmp.lt.s32.totalorder %s644_s17, %s640_s0 }
  0x52   :  { %p647_p10 = por %p646_p9, %p645_p8 }
  0x54   :  { %p648_p11 = pnand %p647_p10, %p641_p7 }
  0x56   :  { %651 = shalt.err (!%p648_p11)
}
  0x57   :  { %54 = dma.hbm_to_vmem [thread:$0]  %s1015_s2, 16, %s52_s18, [#allocation6]  }
  0x58   :  { %s652_s13 = scalar_lea.hbm %s1017_s4, 16 }
  0x59   :  { %p653_p12 = scmp.ne.s32.totalorder %s1017_s4, %s652_s13  ;;  %p656_p13 = scmp.lt.u32.totalorder %s652_s13, %s1017_s4 }
  0x5b   :  { %p658_p0 = pnand %p656_p13, %p653_p12 }
  0x5d   :  { %661 = shalt.err (!%p658_p0)
}
  0x5e   :  { %s662_s15 = scalar_lea.vmem %s74_s20, 16  ;;  %s666_s16 = scalar_lea.vmem %s74_s20, 32 }
  0x5f   :  { %p663_p1 = scmp.ne.s32.totalorder %s74_s20, %s662_s15  ;;  %p667_p2 = scmp.lt.s32.totalorder %s74_s20, %s74_s20 }
  0x60   :  { %p668_p3 = scmp.lt.s32.totalorder %s666_s16, %s662_s15 }
  0x62   :  { %p669_p4 = por %p668_p3, %p667_p2 }
  0x64   :  { %p670_p5 = pnand %p669_p4, %p663_p1 }
  0x66   :  { %673 = shalt.err (!%p670_p5)
}
  0x67   :  { %76 = dma.hbm_to_vmem [thread:$0]  %s1017_s4, 16, %s74_s20, [#allocation9]  }
  0x68   :  { %s782_s19 = smov [#allocation13]   ;;  %s674_s26 = scalar_lea.hbm %s1019_s6, 16 }
  0x69   :  { %s95_s23 = sshll.u32 %s782_s19, 4  ;;  %p675_p6 = scmp.ne.s32.totalorder %s1019_s6, %s674_s26  ;;  %s96_s23 = int_to_ptr.vmem [resolvable:$true] %s95_s23 }
  0x6a   :  { %p678_p7 = scmp.lt.u32.totalorder %s674_s26, %s1019_s6 }
  0x6c   :  { %p680_p8 = pnand %p678_p7, %p675_p6 }
  0x6e   :  { %683 = shalt.err (!%p680_p8)
}
  0x6f   :  { %s684_s17 = scalar_lea.vmem %s96_s23, 16  ;;  %s688_s4 = scalar_lea.vmem %s96_s23, 32 }
  0x70   :  { %p685_p9 = scmp.ne.s32.totalorder %s96_s23, %s684_s17  ;;  %p689_p10 = scmp.lt.s32.totalorder %s96_s23, %s96_s23 }
  0x71   :  { %p690_p11 = scmp.lt.s32.totalorder %s688_s4, %s684_s17 }
  0x73   :  { %p691_p12 = por %p690_p11, %p689_p10 }
  0x75   :  { %p692_p13 = pnand %p691_p12, %p685_p9 }
  0x77   :  { %695 = shalt.err (!%p692_p13)
}
  0x78   :  { %98 = dma.hbm_to_vmem [thread:$0]  %s1019_s6, 16, %s96_s23, [#allocation12]  }
  0x79   :  { %762 = dma.done.wait [#allocation3], 256  }
  0x7a   :  { %763 = vsyncadd [#allocation3], 4294967040 }
  0x7b   :  { %764 = dma.done.wait [#allocation6], 528  }
  0x7c   :  { %765 = vsyncadd [#allocation6], 4294966768 }
  0x7d   :  { %766 = dma.done.wait [#allocation9], 528  }
  0x7e   :  { %767 = vsyncadd [#allocation9], 4294966768 }
  0x7f   :  { %768 = dma.done.wait [#allocation12], 528  }
  0x80   :  { %769 = vsyncadd [#allocation12], 4294966768  ;;  %v122_v0 = vld [vmem:[#allocation5] sm:$0xff]  ;;  %v123_v1 = vld [vmem:[#allocation5 + $0x8] sm:$0xff]  ;;  %vm133_vm0 = vcmask 261120   ;;  %s783_s6 = smov [#allocation15]  }
  0x81   :  { %v124_v2 = vld [vmem:[#allocation5 + $0x10] sm:$0xff]  ;;  %v506_v3 = vpack.c.bf16 %v123_v1, %v122_v0  ;;  %v125_v4 = vld [vmem:[#allocation5 + $0x18] sm:$0xff]  ;;  %v219_v5 = vld [vmem:[#allocation8] sm:$0xff]  ;;  %s412_s29 = sshll.u32 %s783_s6, 4  ;;  %s784_s30 = smov [#allocation14]   ;;  %s413_s29 = int_to_ptr.vmem [resolvable:$true] %s412_s29 }
  0x82   :  { %v220_v6 = vld [vmem:[#allocation8 + $0x8] sm:$0xff]  ;;  %v510_v7 = vpack.c.bf16 %v125_v4, %v124_v2  ;;  %v221_v12 = vld [vmem:[#allocation8 + $0x10] sm:$0xff]  ;;  %v222_v13 = vld [vmem:[#allocation8 + $0x18] sm:$0xff]  ;;  %s400_s11 = sshll.u32 %s784_s30, 4  ;;  %s785_s13 = smov [#allocation17]   ;;  %s953_s11 = int_to_ptr.vmem [resolvable:$true] %s400_s11 }
  0x83   :  { %v514_v8 = vpack.c.bf16 %v220_v6, %v219_v5  ;;  %v120_v9 = vld [vmem:[#allocation2] sm:$0xff]  ;;  %v307_v10 = vld [vmem:[#allocation11] sm:$0xff]  ;;  %507 = vmatprep.subr.bf16.mxu0 %v506_v3  ;;  %v518_v14 = vpack.c.bf16 %v222_v13, %v221_v12  ;;  %v310_v17 = vld [vmem:[#allocation11 + $0x18] sm:$0xff]  ;;  %s957_s1 = sshll.u32 %s785_s13, 4  ;;  %s696_s10 = scalar_lea.vmem %s413_s29, 256  ;;  %s425_s1 = int_to_ptr.vmem [resolvable:$true] %s957_s1 }
  0x84   :  { %481 = vmatprep.mubr.msk.f32.mxu0 %vm133_vm0, %v120_v9  ;;  %v308_v11 = vld [vmem:[#allocation11 + $0x8] sm:$0xff]  ;;  %509 = vmatpush3.bf16.msra.mxu0 %v506_v3  ;;  %v309_v16 = vld [vmem:[#allocation11 + $0x10] sm:$0xff]  ;;  %v446_v20 = vld [vmem:[#allocation7] ss:$0 sm:$0xff]  ;;  %p697_p0 = scmp.ne.s32.totalorder %s413_s29, %s696_s10  ;;  %p701_p1 = scmp.lt.s32.totalorder %s413_s29, %s413_s29 }
  0x85   :  { %515 = vmatprep.subr.bf16.mxu1 %v514_v8  ;;  %511 = vmatprep.subr.bf16.mxu0 %v510_v7  ;;  %v522_v15 = vpack.c.bf16 %v308_v11, %v307_v10  ;;  %v121_v18 = vld [vmem:[#allocation2 + $0x8] sm:$0xff]  ;;  %v526_v19 = vpack.c.bf16 %v310_v17, %v309_v16  ;;  %v449_v21 = vld [vmem:[#allocation10] ss:$0 sm:$0xff]  ;;  %v452_v32 = vld [vmem:[#allocation13] ss:$0 sm:$0xff]  ;;  %p702_p2 = scmp.lt.s32.totalorder %s696_s10, %s696_s10 }
  0x86   :  { %517 = vmatpush3.bf16.msra.mxu1 %v514_v8  ;;  %492 = vmatprep.mubr.msk.f32.mxu1 %vm133_vm0, %v120_v9 }
  0x87   :  { %519 = vmatprep.subr.bf16.mxu1 %v518_v14  ;;  %p703_p3 = por %p702_p2, %p701_p1 }
  0x88   :  { %513 = vmatpush3.bf16.msra.mxu0 %v510_v7 }
  0x89   :  { %523 = vmatprep.subr.bf16.mxu0 %v522_v15  ;;  %p704_p4 = pnand %p703_p3, %p697_p0 }
  0x8a   :  { %521 = vmatpush3.bf16.msra.mxu1 %v518_v14 }
  0x8b   :  { %482 = vmatmul.mubr.msk.f32.vlgmr.msra.gmra.mrb[0].mxu0 %vm133_vm0, %v121_v18 }
  0x8c   :  { %525 = vmatpush3.bf16.msra.mxu0 %v522_v15  ;;  %503 = vmatprep.mubr.msk.f32.mxu0 %vm133_vm0, %v120_v9 }
  0x8d   :  { %493 = vmatmul.mubr.msk.f32.vlgmr.msra.gmra.mrb[0].mxu1 %vm133_vm0, %v121_v18  ;;  %527 = vmatprep.subr.bf16.mxu0 %v526_v19 }
  0x90   :  { %529 = vmatpush3.bf16.msra.mxu0 %v526_v19 }
  0x93   :  { %504 = vmatmul.mubr.msk.f32.vlgmr.msra.gmra.mrb[2].mxu0 %vm133_vm0, %v121_v18 }
 0x15e   :  { %v483_v22 = vpop.f32.mrb[0].mxu0 }
 0x15f   :  { %v212_v23 = vadd.f32 %v483_v22, %v446_v20  ;;  %v206_v24 = vpop.f32.mrb[1].mxu0 }
 0x160   :  { %v494_v25 = vpop.f32.mrb[0].mxu1  ;;  %v207_v26 = vadd.f32 %v446_v20, %v206_v24 }
 0x161   :  { %v302_v27 = vadd.f32 %v494_v25, %v449_v21  ;;  %v296_v28 = vpop.f32.mrb[1].mxu1  ;;  %v216_v29 = vmul.f32 0.35355338, %v212_v23 }
 0x162   :  { %v297_v30 = vadd.f32 %v449_v21, %v296_v28  ;;  %v215_v31 = vmul.f32 0.35355338, %v207_v26 }
 0x163   :  { %306 = vst.msk [vmem:[#allocation15 + $0x8] sm:$0xff] %vm133_vm0, %v302_v27  ;;  %218 = vst.msk [vmem:[#allocation14 + $0x8] sm:$0xff] %vm133_vm0, %v216_v29 }
 0x164   :  { %305 = vst.msk [vmem:[#allocation15] sm:$0xff] %vm133_vm0, %v297_v30  ;;  %217 = vst.msk [vmem:[#allocation14] sm:$0xff] %vm133_vm0, %v215_v31 }
 0x165   :  { %707 = shalt.err (!%p704_p4)
}
 0x166   :  { %s708_s15 = scalar_lea.hbm %s1021_s8, 256 }
 0x167   :  { %p709_p5 = scmp.ne.s32.totalorder %s1021_s8, %s708_s15  ;;  %p712_p6 = scmp.lt.u32.totalorder %s708_s15, %s1021_s8 }
 0x169   :  { %p714_p7 = pnand %p712_p6, %p709_p5 }
 0x16b   :  { %717 = shalt.err (!%p714_p7)
}
 0x16c   :  { %418 = dma.vmem_to_hbm [thread:$0]  %s413_s29, 256, %s1021_s8, [#allocation16], %s776_s21, %s776_s21, %s777_s22  }
 0x16d   :  { %s718_s25 = scalar_lea.vmem %s953_s11, 256  ;;  %p723_p9 = scmp.lt.s32.totalorder %s953_s11, %s953_s11 }
 0x16e   :  { %p719_p8 = scmp.ne.s32.totalorder %s953_s11, %s718_s25  ;;  %p724_p10 = scmp.lt.s32.totalorder %s718_s25, %s718_s25 }
 0x170   :  { %p725_p11 = por %p724_p10, %p723_p9 }
 0x172   :  { %p726_p12 = pnand %p725_p11, %p719_p8 }
 0x174   :  { %729 = shalt.err (!%p726_p12)
}
 0x175   :  { %s730_s12 = scalar_lea.hbm %s1020_s7, 256 }
 0x176   :  { %p731_p13 = scmp.ne.s32.totalorder %s1020_s7, %s730_s12  ;;  %p734_p0 = scmp.lt.u32.totalorder %s730_s12, %s1020_s7 }
 0x178   :  { %p736_p1 = pnand %p734_p0, %p731_p13 }
 0x17a   :  { %739 = shalt.err (!%p736_p1)
}
 0x17b   :  { %406 = dma.vmem_to_hbm [thread:$0]  %s953_s11, 256, %s1020_s7, [#allocation4], %s776_s21, %s776_s21, %s777_s22   ;;  %v505_v33 = vpop.f32.mrb[2].mxu0 }
 0x17c   :  { %v390_v34 = vadd.f32 %v505_v33, %v452_v32  ;;  %v384_v35 = vpop.f32.mrb[3].mxu0  ;;  %s740_s28 = scalar_lea.vmem %s425_s1, 256  ;;  %p745_p3 = scmp.lt.s32.totalorder %s425_s1, %s425_s1 }
 0x17d   :  { %v385_v36 = vadd.f32 %v452_v32, %v384_v35  ;;  %p741_p2 = scmp.ne.s32.totalorder %s425_s1, %s740_s28  ;;  %p746_p4 = scmp.lt.s32.totalorder %s740_s28, %s740_s28 }
 0x17e   :  { %394 = vst.msk [vmem:[#allocation17 + $0x8] sm:$0xff] %vm133_vm0, %v390_v34 }
 0x17f   :  { %393 = vst.msk [vmem:[#allocation17] sm:$0xff] %vm133_vm0, %v385_v36  ;;  %p747_p5 = por %p746_p4, %p745_p3 }
 0x181   :  { %p748_p6 = pnand %p747_p5, %p741_p2 }
 0x183   :  { %751 = shalt.err (!%p748_p6)
}
 0x184   :  { %s752_s7 = scalar_lea.hbm %s1022_s9, 256 }
 0x185   :  { %p753_p7 = scmp.ne.s32.totalorder %s1022_s9, %s752_s7  ;;  %p756_p8 = scmp.lt.u32.totalorder %s752_s7, %s1022_s9 }
 0x187   :  { %p758_p9 = pnand %p756_p8, %p753_p7 }
 0x189   :  { %761 = shalt.err (!%p758_p9)
}
 0x18a   :  { %430 = dma.vmem_to_hbm [thread:$0]  %s425_s1, 256, %s1022_s9, [#allocation16], %s776_s21, %s776_s21, %s777_s22  }
 0x18b   :  { %770 = dma.done.wait [#allocation4], 256  }
 0x18c   :  { %771 = vsyncadd [#allocation4], 4294967040 }
 0x18d   :  { %772 = dma.done.wait [#allocation16], 512  }
 0x18e   :  { %773 = vsyncadd [#allocation16], 4294966784 }
 0x18f   :  { %440 = vsyncpa [#allocation3], 1 }
 0x190   :  { %441 = vsyncpa [#allocation6], 1 }
 0x191   :  { %442 = vsyncpa [#allocation9], 1 }
 0x192   :  { %443 = vsyncpa [#allocation12], 1 }
 0x193   :  { %444 = vsyncpa [#allocation4], 1 }
 0x194   :  { %445 = vsyncpa [#allocation16], 1 }

</bundles_post_ra>
